<compile_context>
chip_gen: v5e
topology: v5e:2x2
jax: 0.10.0
libtpu: 0.0.40
codegen_flags: <defaults>
</compile_context>

<pallas_src>
import functools
import math

import jax
import jax.numpy as jnp
from jax import lax
from jax.experimental import pallas as pl
from jax.experimental.pallas import tpu as pltpu


# ---------------------------------------------------------------------------
# Hardware / capability helpers
# ---------------------------------------------------------------------------
def _vmem_capacity_bytes():
    """Per-core VMEM capacity; conservative v7x-sized fallback if unqueryable."""
    try:
        return int(pltpu.get_tpu_info().vmem_capacity_bytes)
    except Exception:
        return 64 * 2**20


def _vmem_limit_bytes(need_bytes):
    """Scoped-VMEM request: 2x margin over the block/scratch need, capped below
    physical capacity (fixes the old min(100 MiB, 2x double-counted) logic)."""
    cap = _vmem_capacity_bytes()
    return int(min(cap - 4 * 2**20, max(2 * need_bytes, 32 * 2**20)))


@functools.lru_cache(maxsize=None)
def _single_buffer_supported():
    """Probe whether BlockSpec(pipeline_mode=pl.Buffered(1)) lowers on this jax."""
    try:
        def _probe(x_ref, o_ref):
            o_ref[...] = x_ref[...]

        out = pl.pallas_call(
            _probe,
            out_shape=jax.ShapeDtypeStruct((8, 128), jnp.float32),
            grid=(1,),
            in_specs=[pl.BlockSpec((8, 128), lambda i: (0, 0),
                                   pipeline_mode=pl.Buffered(1))],
            out_specs=pl.BlockSpec((8, 128), lambda i: (0, 0)),
        )(jnp.zeros((8, 128), jnp.float32))
        jax.block_until_ready(out)
        return True
    except Exception:
        return False


def _resident_spec(block_shape, index_map):
    """Spec for a block whose index is constant across the grid: single-buffer
    it (halves its resident VMEM footprint) when supported."""
    if _single_buffer_supported():
        return pl.BlockSpec(block_shape, index_map, pipeline_mode=pl.Buffered(1))
    return pl.BlockSpec(block_shape, index_map)


# ---------------------------------------------------------------------------
# Tile-size heuristics
# ---------------------------------------------------------------------------
def _row_tile(rows, target=256):
    """Row tile for a cdiv grid: full extent when tiny, >=2 tiles whenever
    possible (v7x megacore), capped at `target` (256-wide MXU / pipeline sweet
    spot).  Tail blocks are padded-read / clipped-write by Pallas."""
    if rows <= 8:
        return rows
    if rows <= 2 * target:
        half = (rows + 1) // 2
        return min(rows, ((half + 7) // 8) * 8)
    return target


def _reduce_tile(k):
    """Contraction tile for the linear kernel: full K when modest, else the
    largest 128-aligned divisor (no tail masking needed)."""
    if k <= 1024:
        return k
    for t in (1024, 512, 256):
        if k % t == 0:
            return t
    # TODO(synk): mask the K tail so awkward large K can still be tiled.
    return k


def _kv_tile(n, tq, width, itemsize, vmem_cap):
    """KV-sequence tile: full n when (double-buffered) KV + live f32 score
    tiles fit in ~1/3 of VMEM, otherwise the largest fitting candidate
    (divisors preferred so no tail masking is required)."""
    budget = max(vmem_cap // 3, 8 * 2**20)

    def cost(t):
        return 2 * t * 2 * width * itemsize + 3 * 4 * tq * t

    if cost(n) <= budget:
        return n
    candidates = [t for t in (4096, 2048, 1024, 512, 256)
                  if t < n and cost(t) <= budget]
    for t in candidates:
        if n % t == 0:
            return t
    return candidates[0] if candidates else 256


def _attn_vmem_need(tq, tn, width, itemsize, num_heads, head_dim, flash):
    lane = lambda d: -(-d // 128) * 128
    sub = lambda r: -(-r // 8) * 8
    blocks = 2 * tq * width * itemsize          # q (double-buffered)
    blocks += 2 * tq * width * itemsize         # out
    blocks += 2 * tn * 2 * width * itemsize     # kv (count 2x even if Buffered(1))
    scratch = 0
    if flash:
        scratch += 2 * num_heads * sub(tq) * lane(1) * 4          # running max / sum
        scratch += num_heads * sub(tq) * lane(head_dim) * 4        # running PV acc
    live = 3 * sub(tq) * lane(tn) * 4 + 2 * sub(tq) * lane(width) * 4
    return blocks + scratch + live


def _linear_vmem_need(tm, tk, n_out, itemsize):
    lane = lambda d: -(-d // 128) * 128
    sub = lambda r: -(-r // 8) * 8
    blocks = 2 * tm * tk * itemsize + 2 * n_out * tk * itemsize
    blocks += 2 * n_out * itemsize + 2 * tm * n_out * itemsize
    scratch = sub(tm) * lane(n_out) * 4
    live = sub(tm) * lane(n_out) * 4
    return blocks + scratch + live


# ---------------------------------------------------------------------------
# Attention kernels
# ---------------------------------------------------------------------------
def _head_slices(q_tile, kv_tile, h, num_heads, head_dim, kv_split):
    width = num_heads * head_dim
    q_h = q_tile[:, h * head_dim:(h + 1) * head_dim]
    if kv_split:
        # [K_all | V_all] layout (wkv rows pre-permuted in the wrapper): K/V
        # halves sit at clean width boundaries.
        k_h = kv_tile[:, h * head_dim:(h + 1) * head_dim]
        v_h = kv_tile[:, width + h * head_dim: width + (h + 1) * head_dim]
    else:
        # PyTorch-native interleaved [K_h | V_h] per head.
        base = 2 * h * head_dim
        k_h = kv_tile[:, base: base + head_dim]
        v_h = kv_tile[:, base + head_dim: base + 2 * head_dim]
    return q_h, k_h, v_h


def _attn_kernel_single(q_ref, kv_ref, o_ref, *, num_heads, head_dim, scale,
                        kv_split, exp_dtype):
    """Single-pass kernel (full n in one KV tile).
    q_ref: (1, tq, width)  kv_ref: (1, n, 2*width)  o_ref: (1, tq, width)."""
    q_tile = q_ref[0] * scale              # 1/sqrt(d) folded into q once
    kv_tile = kv_ref[0]

    outs = []
    for h in range(num_heads):             # static unroll; H is small
        q_h, k_h, v_h = _head_slices(q_tile, kv_tile, h, num_heads, head_dim, kv_split)

        # scores = q_h @ k_h^T: contract minor dims, no XLU transpose.
        s = lax.dot_general(q_h, k_h, (((1,), (1,)), ((), ())),
                            preferred_element_type=jnp.float32)          # (tq, n)
        s_max = jnp.max(s, axis=-1, keepdims=True)
        p = jnp.exp((s - s_max).astype(exp_dtype))                        # (tq, n)
        l = jnp.sum(p.astype(jnp.float32), axis=-1, keepdims=True)
        inv = pl.reciprocal(l, approx=True)                               # EUP slot

        o_h = lax.dot_general(p.astype(v_h.dtype), v_h, (((1,), (0,)), ((), ())),
                              preferred_element_type=jnp.float32)         # (tq, d)
        # Normalize + downcast per head before the concat (halves live bytes).
        outs.append((o_h * inv).astype(o_ref.dtype))

    o_ref[0] = jnp.concatenate(outs, axis=-1)   # single lane-dense slab store


def _attn_kernel_flash(q_ref, kv_ref, o_ref, m_sc, l_sc, acc_sc, *,
                       num_heads, head_dim, scale, kv_split, n_total, tile_n,
                       mask_n, exp_dtype):
    """Flash-style kernel: online softmax across the n (KV) grid axis.
    m_sc/l_sc: (H, tq, 1) f32   acc_sc: (H, tq, head_dim) f32."""
    k_step = pl.program_id(2)

    @pl.when(k_step == 0)
    def _init():
        m_sc[...] = jnp.full(m_sc.shape, -jnp.inf, dtype=m_sc.dtype)
        l_sc[...] = jnp.zeros(l_sc.shape, dtype=l_sc.dtype)
        acc_sc[...] = jnp.zeros(acc_sc.shape, dtype=acc_sc.dtype)

    q_tile = q_ref[0] * scale
    kv_tile = kv_ref[0]

    if mask_n:
        col_row = k_step * tile_n + lax.broadcasted_iota(jnp.int32, (1, tile_n), 1)
        score_valid = col_row < n_total                                   # (1, tn)
        col_v = k_step * tile_n + lax.broadcasted_iota(jnp.int32, (tile_n, 1), 0)
        v_valid = col_v < n_total                                         # (tn, 1)

    for h in range(num_heads):
        q_h, k_h, v_h = _head_slices(q_tile, kv_tile, h, num_heads, head_dim, kv_split)

        s = lax.dot_general(q_h, k_h, (((1,), (1,)), ((), ())),
                            preferred_element_type=jnp.float32)          # (tq, tn)
        if mask_n:
            s = jnp.where(score_valid, s, -jnp.inf)
            v_h = jnp.where(v_valid, v_h, jnp.zeros((), v_h.dtype))

        m_prev = m_sc[h]
        m_new = jnp.maximum(m_prev, jnp.max(s, axis=-1, keepdims=True))
        alpha = jnp.exp(m_prev - m_new)
        p = jnp.exp((s - m_new).astype(exp_dtype))
        l_sc[h] = alpha * l_sc[h] + jnp.sum(p.astype(jnp.float32), axis=-1,
                                            keepdims=True)
        pv = lax.dot_general(p.astype(v_h.dtype), v_h, (((1,), (0,)), ((), ())),
                             preferred_element_type=jnp.float32)          # (tq, d)
        acc_sc[h] = alpha * acc_sc[h] + pv
        m_sc[h] = m_new

    @pl.when(k_step == pl.num_programs(2) - 1)
    def _finalize():
        outs = []
        for h in range(num_heads):
            inv = pl.reciprocal(l_sc[h], approx=True)
            outs.append((acc_sc[h] * inv).astype(o_ref.dtype))
        o_ref[0] = jnp.concatenate(outs, axis=-1)


def qkv_multihead_cross_attention(q, kv, *, num_heads, kv_layout="interleaved",
                                  tile_n=None):
    """Pallas equivalent of QKVMultiheadCrossAttention.forward.

    q:  (bs, m, width)  kv: (bs, n, 2*width)  ->  (bs, m, width)
    kv_layout: "interleaved" (PyTorch [K_h|V_h] per head) or "split" ([K|V])."""
    bs, m, width = q.shape
    kb, n, kv_width = kv.shape
    assert kb == bs and kv_width == 2 * width and width % num_heads == 0
    head_dim = width // num_heads
    scale = 1.0 / math.sqrt(head_dim)
    itemsize = jnp.dtype(q.dtype).itemsize
    kv_split = (kv_layout == "split")
    # bf16 exp roughly doubles EUP throughput on v6e/v7x where small head_dim
    # makes the kernel transcendental-bound; keep f32 for f32 inputs (and v5e).
    exp_dtype = jnp.bfloat16 if q.dtype == jnp.bfloat16 else jnp.float32

    vmem_cap = _vmem_capacity_bytes()
    tq = _row_tile(m)
    tn = min(n, tile_n) if tile_n is not None else _kv_tile(n, tq, width, itemsize, vmem_cap)
    assert tn == n or tn % 8 == 0
    m_tiles = pl.cdiv(m, tq)
    n_tiles = pl.cdiv(n, tn)
    mask_n = (n % tn) != 0
    flash = n_tiles > 1

    q_spec = pl.BlockSpec((1, tq, width), lambda b, i, k: (b, i, 0))
    o_spec = pl.BlockSpec((1, tq, width), lambda b, i, k: (b, i, 0))
    kv_imap = lambda b, i, k: (b, k, 0)
    if n_tiles == 1:
        # KV block index is constant across the m axis -> it is revisited, not
        # re-DMA'd: single-buffer it to halve the resident footprint (v7x 64 MiB).
        kv_spec = _resident_spec((1, tn, 2 * width), kv_imap)
    else:
        kv_spec = pl.BlockSpec((1, tn, 2 * width), kv_imap)

    if flash:
        kernel = functools.partial(
            _attn_kernel_flash, num_heads=num_heads, head_dim=head_dim,
            scale=scale, kv_split=kv_split, n_total=n, tile_n=tn, mask_n=mask_n,
            exp_dtype=exp_dtype)
        scratch_shapes = [
            pltpu.VMEM((num_heads, tq, 1), jnp.float32),
            pltpu.VMEM((num_heads, tq, 1), jnp.float32),
            pltpu.VMEM((num_heads, tq, head_dim), jnp.float32),
        ]
    else:
        kernel = functools.partial(
            _attn_kernel_single, num_heads=num_heads, head_dim=head_dim,
            scale=scale, kv_split=kv_split, exp_dtype=exp_dtype)
        scratch_shapes = []

    vmem_limit = _vmem_limit_bytes(
        _attn_vmem_need(tq, tn, width, itemsize, num_heads, head_dim, flash))

    return pl.pallas_call(
        kernel,
        out_shape=jax.ShapeDtypeStruct((bs, m, width), q.dtype),
        grid_spec=pltpu.PrefetchScalarGridSpec(
            num_scalar_prefetch=0,
            grid=(bs, m_tiles, n_tiles),          # reduction (n) axis last
            in_specs=[q_spec, kv_spec],
            out_specs=o_spec,
            scratch_shapes=scratch_shapes,
        ),
        compiler_params=pltpu.CompilerParams(
            dimension_semantics=("parallel", "parallel", "arbitrary"),
            vmem_limit_bytes=vmem_limit,
        ),
    )(q, kv)


# ---------------------------------------------------------------------------
# Linear (c_q / c_kv / c_proj): y = x @ W^T + b, PyTorch weight layout (N, K).
# ---------------------------------------------------------------------------
def _linear_kernel(x_ref, w_ref, b_ref, o_ref, acc_ref):
    k = pl.program_id(1)

    @pl.when(k == 0)
    def _init():
        acc_ref[...] = jnp.zeros(acc_ref.shape, acc_ref.dtype)

    # Contract the minor dims of both operands (x:(tm,tk), W:(N,tk)); no
    # wrapper-side transpose.  TODO(synk): verify in the Mosaic bundle that no
    # per-step relayout of the weight tile is emitted; pre-transpose W if so.
    acc_ref[...] += lax.dot_general(
        x_ref[...], w_ref[...],
        dimension_numbers=(((1,), (1,)), ((), ())),
        preferred_element_type=jnp.float32)

    @pl.when(k == pl.num_programs(1) - 1)
    def _finalize():
        o_ref[...] = (acc_ref[...] + b_ref[...].astype(jnp.float32)).astype(o_ref.dtype)


def pallas_linear(x, w, b=None):
    lead = x.shape[:-1]
    K = x.shape[-1]
    N = w.shape[0]
    x2d = x.reshape(-1, K)
    M = x2d.shape[0]
    bias = (jnp.zeros((1, N), dtype=x.dtype) if b is None
            else b.reshape(1, N).astype(x.dtype))

    itemsize = jnp.dtype(x.dtype).itemsize
    tm = _row_tile(M)                 # cdiv grid; >=2 tiles for the v7x megacore
    tk = _reduce_tile(K)              # K tiled as an f32-accumulated reduction
    m_tiles = pl.cdiv(M, tm)
    k_tiles = K // tk

    vmem_limit = _vmem_limit_bytes(_linear_vmem_need(tm, tk, N, itemsize))

    w_imap = lambda i, k: (0, k)
    w_spec = (_resident_spec((N, tk), w_imap) if k_tiles == 1
              else pl.BlockSpec((N, tk), w_imap))
    b_spec = _resident_spec((1, N), lambda i, k: (0, 0))

    out = pl.pallas_call(
        _linear_kernel,
        out_shape=jax.ShapeDtypeStruct((M, N), x.dtype),
        grid_spec=pltpu.PrefetchScalarGridSpec(
            num_scalar_prefetch=0,
            grid=(m_tiles, k_tiles),
            in_specs=[pl.BlockSpec((tm, tk), lambda i, k: (i, k)), w_spec, b_spec],
            out_specs=pl.BlockSpec((tm, N), lambda i, k: (i, 0)),
            scratch_shapes=[pltpu.VMEM((tm, N), jnp.float32)],
        ),
        compiler_params=pltpu.CompilerParams(
            dimension_semantics=("parallel", "arbitrary"),
            vmem_limit_bytes=vmem_limit,
        ),
    )(x2d, w, bias)
    return out.reshape(*lead, N)


# ---------------------------------------------------------------------------
# Full CrossAttention.forward
# ---------------------------------------------------------------------------
def _split_kv_weight(wkv, bkv, num_heads):
    """Permute wkv rows once so the kv projection emits [K_all | V_all] halves
    instead of per-head interleaved [K_h|V_h] (free at the wrapper, removes
    per-step strided head slicing in the kernel)."""
    two_width = wkv.shape[0]
    width = two_width // 2
    d = width // num_heads
    idx = jnp.arange(two_width).reshape(num_heads, 2, d)
    perm = jnp.concatenate([idx[:, 0, :].reshape(-1), idx[:, 1, :].reshape(-1)])
    wkv_s = wkv[perm]
    bkv_s = None if bkv is None else bkv[perm]
    return wkv_s, bkv_s


def cross_attention_forward(queries, x, params, *, num_heads):
    # TODO(synk): torch.utils.checkpoint is a training-time recompute trick;
    # forward math is identical, so it is simply omitted here.
    q = pallas_linear(queries, params["wq"], params.get("bq"))
    wkv_s, bkv_s = _split_kv_weight(params["wkv"], params.get("bkv"), num_heads)
    kv = pallas_linear(x, wkv_s, bkv_s)
    attn = qkv_multihead_cross_attention(q, kv, num_heads=num_heads,
                                         kv_layout="split")
    return pallas_linear(attn, params["wproj"], params.get("bproj"))


# ---------------------------------------------------------------------------
# Pure-JAX references (reproduce the PyTorch non-sdpa branch)
# ---------------------------------------------------------------------------
def _reference_attention(q, kv, *, num_heads):
    bs, m, width = q.shape
    _, n, _ = kv.shape
    d = width // num_heads
    qh = q.reshape(bs, m, num_heads, d).transpose(0, 2, 1, 3)
    kvh = kv.reshape(bs, n, num_heads, 2 * d)
    k, v = jnp.split(kvh, 2, axis=-1)
    k = k.transpose(0, 2, 1, 3)
    v = v.transpose(0, 2, 1, 3)
    scale = 1.0 / math.sqrt(d)
    w = jax.nn.softmax(jnp.einsum("bhmc,bhnc->bhmn", qh, k * scale), axis=-1)
    out = jnp.einsum("bhmn,bhnc->bhmc", w, v)
    return out.transpose(0, 2, 1, 3).reshape(bs, m, width)


def _reference_cross_attention(queries, x, params, *, num_heads):
    q = queries @ params["wq"].T
    kv = x @ params["wkv"].T
    attn = _reference_attention(q, kv, num_heads=num_heads)
    return attn @ params["wproj"].T + params["bproj"]


if __name__ == "__main__":
    # Shapes consistent with the module: batch=2, query len m=16, kv len n=8,
    # query_channels=32, in_channels=24, num_heads=4, inner_product_channels=8.
    bs, m, n = 2, 16, 8
    num_heads, head_dim = 4, 8
    query_channels, in_channels = 32, 24
    width = num_heads * head_dim  # 32

    key = jax.random.PRNGKey(0)
    k0, k1, k2, k3, k4, k5, k6, k7 = jax.random.split(key, 8)
    queries = jax.random.normal(k0, (bs, m, query_channels), dtype=jnp.float32)
    x = jax.random.normal(k1, (bs, n, in_channels), dtype=jnp.float32)
    params = {
        "wq": 0.1 * jax.random.normal(k2, (width, query_channels), dtype=jnp.float32),
        "wkv": 0.1 * jax.random.normal(k3, (2 * width, in_channels), dtype=jnp.float32),
        "wproj": 0.1 * jax.random.normal(k4, (query_channels, width), dtype=jnp.float32),
        "bproj": 0.1 * jax.random.normal(k5, (query_channels,), dtype=jnp.float32),
    }

    # 1) Full module forward (uses the split-KV weight layout internally).
    out = cross_attention_forward(queries, x, params, num_heads=num_heads)
    out = jax.block_until_ready(out)
    ref = _reference_cross_attention(queries, x, params, num_heads=num_heads)
    assert out.shape == (bs, m, query_channels)
    # approx (EUP) reciprocal in the softmax -> loosened tolerance.
    assert jnp.allclose(out, ref, atol=1e-2, rtol=1e-2), "cross-attn mismatch"

    # 2) Attention core in isolation (PyTorch interleaved KV layout, single KV tile).
    q_lin = queries @ params["wq"].T
    kv_lin = x @ params["wkv"].T
    attn = qkv_multihead_cross_attention(q_lin, kv_lin, num_heads=num_heads)
    attn = jax.block_until_ready(attn)
    attn_ref = _reference_attention(q_lin, kv_lin, num_heads=num_heads)
    assert jnp.allclose(attn, attn_ref, atol=1e-2, rtol=1e-2), "attention mismatch"

    # 3) Flash (n-tiled online-softmax) path with awkward m / n so the cdiv
    #    m-tail and the masked KV tail are both exercised.
    m2, n2 = 20, 12
    q2 = jax.random.normal(k6, (bs, m2, width), dtype=jnp.float32)
    kv2 = jax.random.normal(k7, (bs, n2, 2 * width), dtype=jnp.float32)
    attn2 = qkv_multihead_cross_attention(q2, kv2, num_heads=num_heads, tile_n=8)
    attn2 = jax.block_until_ready(attn2)
    attn2_ref = _reference_attention(q2, kv2, num_heads=num_heads)
    assert jnp.allclose(attn2, attn2_ref, atol=1e-2, rtol=1e-2), "flash attn mismatch"

    print("KERNEL_OK")
</pallas_src>

<mosaic_0001>
module attributes {stable_mosaic.version = 11 : i64} {
  func.func @_probe(%arg0: i32, %arg1: memref<8x128xf32, #tpu.memory_space<vmem>>, %arg2: memref<8x128xf32, #tpu.memory_space<vmem>>) attributes {dimension_semantics = [#tpu.dimension_semantics<arbitrary>], iteration_bounds = array<i64: 1>, scalar_prefetch = 0 : i64, scratch_operands = 0 : i64, tpu.core_type = #tpu.core_type<tc>, window_params = [{pipeline_mode = #tpu.pipeline_mode<synchronous>, transform_indices = @transform_0, window_bounds = array<i64: 8, 128>}, {pipeline_mode = #tpu.pipeline_mode<synchronous>, transform_indices = @transform_1, window_bounds = array<i64: 8, 128>}]} {
    %c0 = arith.constant 0 : index
    %c0_0 = arith.constant 0 : index
    %0 = vector.load %arg1[%c0, %c0_0] : memref<8x128xf32, #tpu.memory_space<vmem>>, vector<8x128xf32>
    %c0_1 = arith.constant 0 : index
    %c0_2 = arith.constant 0 : index
    %1 = vector.load %arg2[%c0_1, %c0_2] : memref<8x128xf32, #tpu.memory_space<vmem>>, vector<8x128xf32>
    tpu.vector_store %arg2[%c0_1, %c0_2], %0 {strides = array<i32>} : memref<8x128xf32, #tpu.memory_space<vmem>>, vector<8x128xf32>,
    return
  }
  func.func @transform_0(%arg0: i32) -> (i32, i32) {
    %c0_i32 = arith.constant 0 : i32
    %c0_i32_0 = arith.constant 0 : i32
    %c0_i32_1 = arith.constant 0 : i32
    return %c0_i32, %c0_i32_0 : i32, i32
  }
  func.func @transform_1(%arg0: i32) -> (i32, i32) {
    %c0_i32 = arith.constant 0 : i32
    %c0_i32_0 = arith.constant 0 : i32
    %c0_i32_1 = arith.constant 0 : i32
    return %c0_i32, %c0_i32_0 : i32, i32
  }
}

module attributes {stable_mosaic.version = 11 : i64} {
  func.func @_linear_kernel(%arg0: i32, %arg1: i32, %arg2: memref<16x32xf32, #tpu.memory_space<vmem>>, %arg3: memref<32x32xf32, #tpu.memory_space<vmem>>, %arg4: memref<1x32xf32, #tpu.memory_space<vmem>>, %arg5: memref<16x32xf32, #tpu.memory_space<vmem>>, %arg6: memref<16x32xf32, #tpu.memory_space<vmem>>) attributes {dimension_semantics = [#tpu.dimension_semantics<parallel>, #tpu.dimension_semantics<arbitrary>], iteration_bounds = array<i64: 2, 1>, scalar_prefetch = 0 : i64, scratch_operands = 1 : i64, tpu.core_type = #tpu.core_type<tc>, window_params = [{transform_indices = @transform_0, window_bounds = array<i64: 16, 32>}, {transform_indices = @transform_1, window_bounds = array<i64: 32, 32>}, {pipeline_mode = #tpu.pipeline_mode<synchronous>, transform_indices = @transform_2, window_bounds = array<i64: 1, 32>}, {transform_indices = @transform_3, window_bounds = array<i64: 16, 32>}]} {
    %c0_i32 = arith.constant 0 : i32
    %0 = arith.cmpi eq, %arg1, %c0_i32 : i32
    %1 = arith.extui %0 : i1 to i32
    %c0_i32_0 = arith.constant 0 : i32
    %2 = arith.cmpi ne, %1, %c0_i32_0 : i32
    scf.if %2 {
      %cst_10 = arith.constant 0.000000e+00 : f32
      %12 = vector.broadcast %cst_10 : f32 to vector<16x32xf32>
      %c0_11 = arith.constant 0 : index
      %c0_12 = arith.constant 0 : index
      %13 = vector.load %arg6[%c0_11, %c0_12] : memref<16x32xf32, #tpu.memory_space<vmem>>, vector<16x32xf32>
      tpu.vector_store %arg6[%c0_11, %c0_12], %12 {strides = array<i32>} : memref<16x32xf32, #tpu.memory_space<vmem>>, vector<16x32xf32>,
    } else {
    }
    %c0 = arith.constant 0 : index
    %c0_1 = arith.constant 0 : index
    %3 = vector.load %arg6[%c0, %c0_1] : memref<16x32xf32, #tpu.memory_space<vmem>>, vector<16x32xf32>
    %c0_2 = arith.constant 0 : index
    %c0_3 = arith.constant 0 : index
    %4 = vector.load %arg2[%c0_2, %c0_3] : memref<16x32xf32, #tpu.memory_space<vmem>>, vector<16x32xf32>
    %c0_4 = arith.constant 0 : index
    %c0_5 = arith.constant 0 : index
    %5 = vector.load %arg3[%c0_4, %c0_5] : memref<32x32xf32, #tpu.memory_space<vmem>>, vector<32x32xf32>
    %cst = arith.constant dense<0.000000e+00> : vector<16x32xf32>
    %6 = tpu.matmul %4, %5, %cst {dimension_numbers = #tpu.dot_dimension_numbers<[1], [1], [0], [0], [0, 0, 1, 0], [], []>} : vector<16x32xf32>, vector<32x32xf32>, vector<16x32xf32> -> vector<16x32xf32>
    %7 = arith.addf %3, %6 : vector<16x32xf32>
    %c0_6 = arith.constant 0 : index
    %c0_7 = arith.constant 0 : index
    %8 = vector.load %arg6[%c0_6, %c0_7] : memref<16x32xf32, #tpu.memory_space<vmem>>, vector<16x32xf32>
    tpu.vector_store %arg6[%c0_6, %c0_7], %7 {strides = array<i32>} : memref<16x32xf32, #tpu.memory_space<vmem>>, vector<16x32xf32>,
    %c0_i32_8 = arith.constant 0 : i32
    %9 = arith.cmpi eq, %arg1, %c0_i32_8 : i32
    %10 = arith.extui %9 : i1 to i32
    %c0_i32_9 = arith.constant 0 : i32
    %11 = arith.cmpi ne, %10, %c0_i32_9 : i32
    scf.if %11 {
      %c0_10 = arith.constant 0 : index
      %c0_11 = arith.constant 0 : index
      %12 = vector.load %arg6[%c0_10, %c0_11] : memref<16x32xf32, #tpu.memory_space<vmem>>, vector<16x32xf32>
      %c0_12 = arith.constant 0 : index
      %c0_13 = arith.constant 0 : index
      %13 = vector.load %arg4[%c0_12, %c0_13] : memref<1x32xf32, #tpu.memory_space<vmem>>, vector<1x32xf32>
      %14 = vector.broadcast %13 : vector<1x32xf32> to vector<16x32xf32>
      %15 = arith.addf %12, %14 : vector<16x32xf32>
      %c0_14 = arith.constant 0 : index
      %c0_15 = arith.constant 0 : index
      %16 = vector.load %arg5[%c0_14, %c0_15] : memref<16x32xf32, #tpu.memory_space<vmem>>, vector<16x32xf32>
      tpu.vector_store %arg5[%c0_14, %c0_15], %15 {strides = array<i32>} : memref<16x32xf32, #tpu.memory_space<vmem>>, vector<16x32xf32>,
    } else {
    }
    return
  }
  func.func @transform_0(%arg0: i32, %arg1: i32) -> (i32, i32) {
    %c0_i32 = arith.constant 0 : i32
    return %arg0, %arg1 : i32, i32
  }
  func.func @transform_1(%arg0: i32, %arg1: i32) -> (i32, i32) {
    %c0_i32 = arith.constant 0 : i32
    %c0_i32_0 = arith.constant 0 : i32
    return %c0_i32, %arg1 : i32, i32
  }
  func.func @transform_2(%arg0: i32, %arg1: i32) -> (i32, i32) {
    %c0_i32 = arith.constant 0 : i32
    %c0_i32_0 = arith.constant 0 : i32
    %c0_i32_1 = arith.constant 0 : i32
    return %c0_i32, %c0_i32_0 : i32, i32
  }
  func.func @transform_3(%arg0: i32, %arg1: i32) -> (i32, i32) {
    %c0_i32 = arith.constant 0 : i32
    %c0_i32_0 = arith.constant 0 : i32
    return %arg0, %c0_i32 : i32, i32
  }
}

</mosaic_0001>

<bundles_post_ra>
// kernel: tpu_custom_call.1
= control target key start
LH: loop header
LB: loop body
LE: loop exit
PB: predicated region body
PF: predicated region fallthrough
CT: control target
= control target key end

     0   :  { %6 = vsyncpa [#allocation3], 0  ;;  %s114_s0 = inlined_call_operand.hbm [shape: f32[8,128], index: 0, kind: input, shape index: {}]   ;;  %s115_s1 = inlined_call_operand.hbm [shape: f32[8,128], index: 1, kind: output, shape index: {}]  }
   0x1   :  { %7 = vsyncpa [#allocation4], 0  ;;  %s13_s8 = sshll.u32 %s114_s0, 4  ;;  %s96_s9 = smov [#allocation2]   ;;  %s14_s8 = int_to_ptr.hbm [resolvable:$true] %s13_s8 }
   0x2   :  { %s15_s10 = sshll.u32 %s96_s9, 4  ;;  %s16_s10 = int_to_ptr.vmem [resolvable:$true] %s15_s10 }
   0x3   :  { %18 = dma.hbm_to_vmem [thread:$0]  %s14_s8, 128, %s16_s10, [#allocation3]  }
   0x4   :  { %92 = dma.done.wait [#allocation3], 128  }
   0x5   :  { %93 = vsyncadd [#allocation3], 4294967168  ;;  %s97_s11 = smov [#allocation5]   ;;  %s32_s15 = sshll.u32 %s115_s1, 4  ;;  %v23_v0 = vld [vmem:[#allocation2] sm:$0xff]  ;;  %s33_s15 = int_to_ptr.hbm [resolvable:$true] %s32_s15 }
   0x6   :  { %s30_s12 = sshll.u32 %s97_s11, 4  ;;  %24 = vst [vmem:[#allocation5] sm:$0xff] %v23_v0  ;;  %s31_s12 = int_to_ptr.vmem [resolvable:$true] %s30_s12 }
   0x7   :  { %35 = dma.vmem_to_hbm [thread:$0]  %s31_s12, 128, %s33_s15, [#allocation4]  }
   0x8   :  { %94 = dma.done.wait [#allocation4], 128  }
   0x9   :  { %95 = vsyncadd [#allocation4], 4294967168 }
   0xa   :  { %40 = vsyncpa [#allocation3], 1 }
   0xb   :  { %41 = vsyncpa [#allocation4], 1 }

// kernel: tpu_custom_call.1
= control target key start
LH: loop header
LB: loop body
LE: loop exit
PB: predicated region body
PF: predicated region fallthrough
CT: control target
= control target key end

     0   :  { %s877_s0 = inlined_call_operand.hbm [shape: f32[32,32], index: 0, kind: input, shape index: {}]   ;;  %s878_s1 = inlined_call_operand.hbm [shape: f32[32,32], index: 1, kind: input, shape index: {}]   ;;  %s879_s2 = inlined_call_operand.vmem [shape: f32[1,32], index: 2, kind: input, shape index: {}]   ;;  %s880_s3 = inlined_call_operand.hbm [shape: f32[32,32], index: 3, kind: output, shape index: {}]  }
   0x1   :  { %882 = sst [smem:[#allocation12_spill]] %s878_s1 }
   0x2   :  { %8 = vsyncpa [#allocation4], 0 }
   0x3   :  { %10 = vsyncpa [#allocation4 + $0x1], 0 }
   0x4   :  { %11 = vsyncpa [#allocation7], 0 }
   0x5   :  { %12 = vsyncpa [#allocation5], 0 }
   0x6   :  { %14 = vsyncpa [#allocation5 + $0x1], 0  ;;  %s699_s12 = smov 0   ;;  %s701_s13 = smov 0  }
   0x7   :  { %s703_s14 = smov 0   ;;  %s705_s15 = smov 0  }
   0x8   :  { %s707_s16 = smov 0   ;;  %s709_s17 = smov 0  }
   0x9 LB: > { %s417_s18 = sadd.s32 4294967295, %s671_s17   ;;  %s418_s19 = sadd.s32 4294967294, %s671_s17   ;;  %s671_s17 = sphi %s709_s17, %s20_s17   ;;  %s667_s16 = sphi %s707_s16, %s896_s16   ;;  %s663_s15 = sphi %s705_s15, %s895_s15   ;;  %s659_s14 = sphi %s703_s14, %s894_s14   ;;  %s655_s13 = sphi %s701_s13, %s893_s13   ;;  %s651_s12 = sphi %s699_s12, %s892_s12  }
   0xa   : > { %p54_p0 = scmp.ne.s32.totalorder %s655_s13, %s651_s12  ;;  %p733_p1 = scmp.eq.s32.totalorder %s417_s18, 0 }
   0xb   : > { %p737_p2 = scmp.eq.s32.totalorder %s417_s18, 1  ;;  %p131_p3 = scmp.eq.s32.totalorder %s418_s19, 1 }
   0xc   : > { %p743_p4 = por %p733_p1, %p54_p0  ;;  %p419_p5 = scmp.ge.s32.totalorder %s671_s17, 1 }
   0xd   : > { %p748_p6 = por %p131_p3, %p54_p0  ;;  %p138_p7 = scmp.lt.s32.totalorder %s671_s17, 3 }
   0xe   : > { %s887_s1 = sld [smem:[#allocation12_spill]]  ;;  %s673_s28 = smov [#allocation6]  }
   0xf   : > { %p756_p8 = pnand %p419_p5, %p138_p7  ;;  %s153_s29 = sshll.u32 %s673_s28, 4  ;;  %s154_s29 = int_to_ptr.vmem [resolvable:$true] %s153_s29 }
  0x10   : > { %p421_p11 = scmp.ge.s32.totalorder %s671_s17, 2  ;;  %s881_s30 = smov 128  }
  0x11   : > { %p454_p9 = pneg %p756_p8  ;;  %s675_s4 = smov 8  }
  0x12   : > { %s32_s5 = sadd.s32 1, %s667_s16  ;;  %s41_s6 = sadd.s32 1, %s659_s14 }
  0x13   : > { %p455_p10 = pnand %p454_p9, %p733_p1  ;;  %p34_p12 = scmp.ge.s32.totalorder %s32_s5, 2 }
  0x14   : > { %s151_s26 = sshll.u32 %s887_s1, 4  ;;  %p48_p13 = scmp.ne.s32.totalorder %s659_s14, %s655_s13  ;;  %s152_s26 = int_to_ptr.hbm [resolvable:$true] %s151_s26 }
  0x15   : > { %457 = dma.hbm_to_vmem [thread:$0]  (!%p455_p10), %s152_s26, 512, %s154_s29, [#allocation7], %s881_s30, %s881_s30, %s675_s4  }
  0x16   : > { %p49_p0 = scmp.eq.s32.totalorder %s671_s17, 0  ;;  %s898_s5 = smov (%p34_p12, %s32_s5), 0 }
  0x17   : > { %p781_p5 = por %p737_p2, %p48_p13  ;;  %s36_s9 = ssub.s32 %s667_s16, %s898_s5 }
  0x18   : > { %p775_p3 = por %p49_p0, %p48_p13  ;;  %p467_p7 = scmp.lt.s32.totalorder %s671_s17, 2 }
  0x19   : > { %p39_p9 = scmp.eq.s32.totalorder %s36_s9, 0  ;;  %s170_s10 = sand.u32 1, %s659_s14  }
  0x1a   : > { %s422_s11 = sshll.u32 %s170_s10, 4  ;;  %s440_s19 = sshll.u32 %s667_s16, 4 }
  0x1b   : > { %s790_s18 = scalar_select %p39_p9, %s659_s14, %s41_s6  }
  0x1c   : > { %s180_s26 = scalar_lea.hbm %s877_s0, %s440_s19  ;;  %s174_s28 = scalar_lea.vmem [#allocation3], %s422_s11 }
  0x1d   : > { %s183_s29 = sshll.u32 %s174_s28, 4  ;;  %s181_s21 = sshll.u32 %s180_s26, 4  ;;  %s184_s29 = int_to_ptr.vmem [resolvable:$true] %s183_s29  ;;  %s182_s21 = int_to_ptr.hbm [resolvable:$true] %s181_s21 }
  0x1e   : > { %p459_p2 = pnand %p467_p7, %p775_p3  ;;  %s171_s30 = scalar_lea.sflag [#allocation4], %s170_s10 }
  0x1f   : > { %s891_s1 = smov 128   ;;  %195 = sbr.rel (%p756_p8) target bundleno = 198 (0xc6), region = 32 }
  0x20   : > { %461 = dma.hbm_to_vmem [thread:$0]  (!%p459_p2), %s182_s21, 256, %s184_s29, %s171_s30, %s891_s1, %s891_s1, %s675_s4  }
  0x21   : > { %s804_s6 = sand.u32 (!%p756_p8), 1, %s655_s13  }
  0x22   : > { %s426_s9 = sshll.u32 (!%p756_p8), %s804_s6, 4  ;;  %s198_s11 = scalar_lea.sflag (!%p756_p8), [#allocation4], %s804_s6 }
  0x23   : > { %s201_s7 = scalar_lea.vmem (!%p756_p8), [#allocation3], %s426_s9 }
  0x24   : > { %638 = dma.done.wait (%p743_p4), %s198_s11, 256  }
  0x25   : > { %640 = vsyncadd (%p743_p4), %s198_s11, 4294967040 }
  0x26   : > { %642 = dma.done.wait (%p733_p1), [#allocation7], 512  }
  0x27   : > { %644 = vsyncadd (%p733_p1), [#allocation7], 4294966784  ;;  %vm236_vm0 = vcmask 261120   ;;  %v676_v0 = vmov 0.0   ;;  %v246_v1 = vld [vmem:[#allocation6 + $0x18] sm:$0xff]  ;;  %v245_v2 = vld [vmem:[#allocation6 + $0x10] sm:$0xff] }
  0x28   : > { %237 = vst.msk [vmem:[#allocation2] sm:$0xff] %vm236_vm0, %v676_v0  ;;  %429 = vmatpush.xpose.msk.msra.mxu0 %vm236_vm0, %v246_v1  ;;  %442 = vmatpush.xpose.msk.msra.mxu1 %vm236_vm0, %v246_v1  ;;  %v244_v3 = vld [vmem:[#allocation6 + $0x8] sm:$0xff]  ;;  %v243_v4 = vld [vmem:[#allocation6] sm:$0xff]  ;;  %s441_s1 = sshll.u32 %s663_s15, 4  ;;  %v524_v13 = vld [vmem:[%s879_s2] ss:$0 sm:$0xff] }
  0x29   : > { %238 = vst.msk [vmem:[#allocation2 + $0x8] sm:$0xff] %vm236_vm0, %v676_v0  ;;  %v241_v5 = vld [vmem:[%s201_s7] sm:$0xff]  ;;  %v242_v6 = vld [vmem:[%s201_s7 + $0x8] sm:$0xff]  ;;  %s318_s27 = scalar_lea.hbm %s880_s3, %s441_s1  ;;  %s229_s10 = scalar_lea.vmem [#allocation8], %s426_s9 }
  0x2a   : > { %s319_s19 = sshll.u32 %s229_s10, 4  ;;  %s321_s24 = sshll.u32 %s318_s27, 4  ;;  %s320_s19 = int_to_ptr.vmem [resolvable:$true] %s319_s19  ;;  %s322_s24 = int_to_ptr.hbm [resolvable:$true] %s321_s24 }
  0x2b   : > { %s307_s15 = scalar_lea.sflag [#allocation5], %s804_s6  ;;  %s599_s25 = sshra.s32 %s322_s24, 4  ;;  %s600_s25 = int_to_ptr.hbm [resolvable:$true] %s599_s25 }
  0x2c   : > { %430 = vmatpush.xpose.msk.msra.mxu0 %vm236_vm0, %v245_v2  ;;  %443 = vmatpush.xpose.msk.msra.mxu1 %vm236_vm0, %v245_v2  ;;  %s601_s26 = scalar_lea.hbm %s600_s25, 16  ;;  %s605_s21 = scalar_lea.hbm %s880_s3, 32 }
  0x2d   : > { %p602_p1 = scmp.ne.s32.totalorder %s600_s25, %s601_s26  ;;  %p606_p10 = scmp.lt.s32.totalorder %s600_s25, %s880_s3 }
  0x2e   : > { %p607_p12 = scmp.lt.s32.totalorder %s605_s21, %s601_s26 }
  0x2f   : > { %v239_v7 = vld [vmem:[#allocation2] sm:$0xff]  ;;  %p603_p4 = pnand %p602_p1, %p781_p5 }
  0x30   : > { %431 = vmatpush.xpose.msk.msra.mxu0 %vm236_vm0, %v244_v3  ;;  %444 = vmatpush.xpose.msk.msra.mxu1 %vm236_vm0, %v244_v3  ;;  %v240_v8 = vld [vmem:[#allocation2 + $0x8] sm:$0xff]  ;;  %p608_p13 = por %p607_p12, %p606_p10 }
  0x31   : > { %p604_p8 = pneg %p603_p4 }
  0x33   : > { %p609_p0 = pnand %p608_p13, %p604_p8 }
  0x34   : > { %432 = vmatpush.xpose.msk.msra.mxu0 %vm236_vm0, %v243_v4  ;;  %445 = vmatpush.xpose.msk.msra.mxu1 %vm236_vm0, %v243_v4 }
  0x37   : > { %433 = vmatmul.msk.f32.vlgmr.msra.gmra.mxu0 %vm236_vm0, %v241_v5  ;;  %434 = vmatmul.msk.f32.vlgmr.msra.gmra.mxu1 %vm236_vm0, %v242_v6 }
  0xb4   : > { %v283_v9 = vpop.f32.mrf.mxu0  ;;  %v286_v10 = vpop.f32.mrf.mxu1 }
  0xb5   : > { %v289_v11 = vadd.f32 %v283_v9, %v239_v7  ;;  %v290_v12 = vadd.f32 %v286_v10, %v240_v8 }
  0xb7   : > { %291 = vst.msk [vmem:[#allocation2] sm:$0xff] %vm236_vm0, %v289_v11 }
  0xb8   : > { %292 = vst.msk [vmem:[#allocation2 + $0x8] sm:$0xff] %vm236_vm0, %v290_v12 }
  0xbe   : > { %v296_v14 = vld [vmem:[#allocation2] sm:$0xff] }
  0xbf   : > { %v297_v15 = vld [vmem:[#allocation2 + $0x8] sm:$0xff]  ;;  %v302_v16 = vadd.f32 %v524_v13, %v296_v14 }
  0xc0   : > { %v303_v17 = vadd.f32 %v524_v13, %v297_v15 }
  0xc1   : > { %304 = vst.msk [vmem:[%s229_s10] sm:$0xff] %vm236_vm0, %v302_v16 }
  0xc2   : > { %305 = vst.msk [vmem:[%s229_s10 + $0x8] sm:$0xff] %vm236_vm0, %v303_v17 }
  0xc3   : > { %612 = shalt.err (!%p609_p0)
}
  0xc4   : > { %s677_s6 = smov 128   ;;  %s678_s7 = smov 8  }
  0xc5   : > { %452 = dma.vmem_to_hbm [thread:$0]  (%p781_p5), %s320_s19, 256, %s322_s24, %s307_s15, %s677_s6, %s677_s6, %s678_s7  }
  0xc6 PF: > { %s336_s1 = sand.u32 1, %s651_s12   ;;  %p463_p3 = pnand %p421_p11, %p748_p6 }
  0xc7   : > { %s337_s20 = scalar_lea.sflag [#allocation5], %s336_s1 }
  0xc8   : > { %p464_p7 = pneg %p463_p3 }
  0xca   : > { %646 = dma.done.wait (%p464_p7), %s337_s20, 256  }
  0xcb   : > { %648 = vsyncadd (%p464_p7), %s337_s20, 4294967040  ;;  %s20_s17 = sadd.s32 1, %s671_s17   ;;  %s892_s12 = smov %s655_s13 }
  0xcc   : > { %p17_p9 = scmp.ge.s32.totalorder %s20_s17, 4   ;;  %s893_s13 = smov %s659_s14 }
  0xcd   : > { %s894_s14 = smov %s790_s18  ;;  %s895_s15 = smov %s667_s16 }
  0xce   : > { %s896_s16 = smov %s898_s5  ;;  %19 = sbr.rel (!%p17_p9) target bundleno = 9 (0x9), region = 90 }
  0xd3   :  { %343 = vsyncpa [#allocation4], 1 }
  0xd4   :  { %345 = vsyncpa [#allocation4 + $0x1], 1 }
  0xd5   :  { %346 = vsyncpa [#allocation7], 1 }
  0xd6   :  { %347 = vsyncpa [#allocation5], 1 }
  0xd7   :  { %349 = vsyncpa [#allocation5 + $0x1], 1 }

</bundles_post_ra>
